<compile_context>
chip_gen: v6e
topology: v6e:2x2x1
jax: 0.10.0
libtpu: 0.0.40
codegen_flags: <defaults>
</compile_context>

<pallas_src>
import functools
import math

import jax
import jax.numpy as jnp
from jax import lax
from jax.experimental import pallas as pl
from jax.experimental.pallas import tpu as pltpu

BN_EPS = 1e-5
_LANE = 128
_CHUNK = 1024                                # in-kernel row-chunk for the fc1 intermediate
_VMEM_LIMIT_BYTES = 48 * 1024 * 1024         # fits v7x (64 MiB physical) with headroom


def _round_up(x, m):
    return (x + m - 1) // m * m


def _choose_tile(n, e, itemsize, max_tile_rows=None):
    """Batch tile TN.  Budget the double-buffered x block against its *lane
    padded* VMEM footprint (E is padded to 128 lanes inside VMEM) so large
    tiles still fit v7x's 64 MiB; HBM traffic per step stays the logical
    TN*E*itemsize bytes (~3 MiB with the default budget)."""
    e_pad = _round_up(e, _LANE)
    x_budget = 24 * 1024 * 1024              # double-buffered, lane-padded x blocks
    tn = x_budget // max(1, 2 * e_pad * itemsize)
    tn = min(tn, 64 * 1024)
    tn = max(_CHUNK, (tn // _CHUNK) * _CHUNK)
    if max_tile_rows is not None:
        tn = min(tn, max(_LANE, _round_up(max_tile_rows, _LANE)))
    if n <= tn:
        tn = _round_up(max(n, 1), _LANE)
    return tn


def _stats_kernel(x_ref, w1_ref, b1_ref, stats_ref, acc_ref, *, inner_tiles, chunk):
    """Phase 0: accumulate per-feature sum / sum-of-squares of
    (relu(x@W1+b1) - relu(b1)) into a VMEM scratch; emit on the last step."""
    i = pl.program_id(1)                      # inner ("arbitrary") axis

    @pl.when(i == 0)
    def _():
        acc_ref[...] = jnp.zeros_like(acc_ref)

    hidden = w1_ref.shape[1]
    n_chunks = x_ref.shape[0] // chunk
    w1v = w1_ref[...]
    b1v = b1_ref[...]
    pivot = jnp.maximum(b1v, 0.0)             # exact value of h on zero-padded rows

    def body(k, carry):
        s1, s2 = carry
        r = pl.multiple_of(k * chunk, chunk)
        xb = x_ref[pl.ds(r, chunk), :]
        h = jnp.dot(xb, w1v, preferred_element_type=jnp.float32)
        h = jnp.maximum(h + b1v, 0.0) - pivot
        return (s1 + jnp.sum(h, axis=0, keepdims=True),
                s2 + jnp.sum(h * h, axis=0, keepdims=True))

    zeros = jnp.zeros((1, hidden), jnp.float32)
    s1, s2 = lax.fori_loop(0, n_chunks, body, (zeros, zeros))
    acc_ref[0:1, :] += s1
    acc_ref[1:2, :] += s2

    @pl.when(i == inner_tiles - 1)
    def _():
        stats_ref[...] = acc_ref[...][None, :, :]


def _apply_kernel(x_ref, w1_ref, b1_ref, wf_ref, bf_ref, out_ref, *, chunk):
    """Phase 1: out = relu(x@W1+b1) @ w_fold + b_fold, emitted lane-dense.
    The hidden(=16)-lane reduce is done per 128-row chunk so results land
    lane-major without a full sublane->lane relayout of the tile."""
    n_chunks = x_ref.shape[0] // chunk
    rows_per_chunk = chunk // _LANE
    hidden = w1_ref.shape[1]
    w1v = w1_ref[...]
    b1v = b1_ref[...]
    wfv = wf_ref[...]
    bfv = bf_ref[...]

    @pl.loop(0, n_chunks)
    def _(k):
        r = pl.multiple_of(k * chunk, chunk)
        xb = x_ref[pl.ds(r, chunk), :]
        h = jnp.dot(xb, w1v, preferred_element_type=jnp.float32)
        h = jnp.maximum(h + b1v, 0.0)
        h3 = h.reshape(rows_per_chunk, _LANE, hidden)
        o = jnp.sum(h3 * wfv, axis=-1) + bfv          # (rows_per_chunk, 128)
        rr = pl.multiple_of(k * rows_per_chunk, rows_per_chunk)
        out_ref[0, pl.ds(rr, rows_per_chunk), :] = o.astype(out_ref.dtype)


def treatment_forward(x, w1_t, b1, gamma, beta, w2_t, b2, *,
                      use_bf16_matmul=True, max_tile_rows=None):
    """x: [N, n_embedding] -> predicted_treatment: [N, 1] float32.

    Weights pre-transposed: w1_t [E, 16], w2_t [16, 1]; b1/gamma/beta [1, 16];
    b2 [1, 1].  use_bf16_matmul=True halves x HBM traffic (f32 accumulation and
    f32 BN math are kept)."""
    n, e = x.shape
    hidden = w1_t.shape[1]

    compute_dtype = jnp.bfloat16 if use_bf16_matmul else jnp.float32
    x_in = x.astype(compute_dtype)
    w1_in = w1_t.astype(compute_dtype)
    b1_row = b1.reshape(1, hidden).astype(jnp.float32)

    itemsize = jnp.dtype(compute_dtype).itemsize
    tn = _choose_tile(n, e, itemsize, max_tile_rows)
    chunk = math.gcd(tn, _CHUNK)
    num_tiles = -(-n // tn)
    n_pad = num_tiles * tn
    if n_pad != n:
        x_in = jnp.pad(x_in, ((0, n_pad - n), (0, 0)))   # zero rows: exactly cancelled by pivot

    # ---------------- phase 0: global batch statistics ----------------------
    split = 2 if (num_tiles >= 2 and num_tiles % 2 == 0) else 1   # v7x 2-TC split
    inner_tiles = num_tiles // split

    stats_partials = pl.pallas_call(
        functools.partial(_stats_kernel, inner_tiles=inner_tiles, chunk=chunk),
        out_shape=jax.ShapeDtypeStruct((split, 2, hidden), jnp.float32),
        grid=(split, inner_tiles),
        in_specs=[pl.BlockSpec((tn, e), lambda c, i: (c * inner_tiles + i, 0)),
                  pl.BlockSpec((e, hidden), lambda c, i: (0, 0)),
                  pl.BlockSpec((1, hidden), lambda c, i: (0, 0))],
        out_specs=pl.BlockSpec((1, 2, hidden), lambda c, i: (c, 0, 0)),
        scratch_shapes=[pltpu.VMEM((2, hidden), jnp.float32)],
        compiler_params=pltpu.CompilerParams(
            dimension_semantics=("parallel", "arbitrary"),
            vmem_limit_bytes=_VMEM_LIMIT_BYTES),
    )(x_in, w1_in, b1_row)

    stats = jnp.sum(stats_partials, axis=0)               # (2, hidden)

    # Fold BN (train-mode, biased variance) + fc2 into one 16-wide weight row
    # and a scalar bias (tiny, plain JAX).  Stats are pivoted by relu(b1).
    inv_n = 1.0 / float(n)
    pivot = jnp.maximum(b1_row, 0.0).reshape(hidden)
    mean_c = stats[0] * inv_n                              # E[h - pivot]
    var = jnp.maximum(stats[1] * inv_n - mean_c * mean_c, 0.0)
    mean = mean_c + pivot
    inv_std = lax.rsqrt(var + BN_EPS)
    scale = gamma.reshape(hidden).astype(jnp.float32) * inv_std
    w2v = w2_t.reshape(hidden).astype(jnp.float32)
    w_fold = (scale * w2v).reshape(1, hidden).astype(jnp.float32)
    b_fold = (b2.reshape(()).astype(jnp.float32)
              + jnp.sum((beta.reshape(hidden).astype(jnp.float32) - mean * scale) * w2v)
              ).reshape(1, 1)

    # ---------------- phase 1: apply folded BN + fc2 (lane-dense output) ----
    rows_per_tile = tn // _LANE
    out_tiles = pl.pallas_call(
        functools.partial(_apply_kernel, chunk=chunk),
        out_shape=jax.ShapeDtypeStruct((num_tiles, rows_per_tile, _LANE), jnp.float32),
        grid=(num_tiles,),
        in_specs=[pl.BlockSpec((tn, e), lambda i: (i, 0)),
                  pl.BlockSpec((e, hidden), lambda i: (0, 0)),
                  pl.BlockSpec((1, hidden), lambda i: (0, 0)),
                  pl.BlockSpec((1, hidden), lambda i: (0, 0)),
                  pl.BlockSpec((1, 1), lambda i: (0, 0))],
        out_specs=pl.BlockSpec((1, rows_per_tile, _LANE), lambda i: (i, 0, 0)),
        compiler_params=pltpu.CompilerParams(
            dimension_semantics=("parallel",),
            vmem_limit_bytes=_VMEM_LIMIT_BYTES),
    )(x_in, w1_in, b1_row, w_fold, b_fold)

    return out_tiles.reshape(n_pad, 1)[:n]


def reference_forward(x, w1_t, b1, gamma, beta, w2_t, b2):
    h = jnp.maximum(x @ w1_t + b1, 0.0)
    mean = jnp.mean(h, axis=0, keepdims=True)
    var = jnp.mean((h - mean) ** 2, axis=0, keepdims=True)
    h_bn = (h - mean) / jnp.sqrt(var + BN_EPS) * gamma + beta
    return h_bn @ w2_t + b2


if __name__ == "__main__":
    # Shapes consistent with the module: batch=8, n_embedding=32, hidden=16.
    batch_size = 8
    n_embedding = 32
    hidden = 16

    key = jax.random.PRNGKey(0)
    k_x, k_w1, k_b1, k_w2, k_b2, k_x2 = jax.random.split(key, 6)

    x = jax.random.normal(k_x, (batch_size, n_embedding), dtype=jnp.float32)

    # PyTorch param shapes: W1 [16, E], b1 [16], W2 [1, 16], b2 [1];
    # stored transposed / as broadcast rows for the kernel.
    w1_t = 0.1 * jax.random.normal(k_w1, (n_embedding, hidden), dtype=jnp.float32)
    b1 = 0.1 * jax.random.normal(k_b1, (1, hidden), dtype=jnp.float32)
    gamma = jnp.ones((1, hidden), dtype=jnp.float32)    # BatchNorm1d weight
    beta = jnp.zeros((1, hidden), dtype=jnp.float32)    # BatchNorm1d bias
    w2_t = 0.1 * jax.random.normal(k_w2, (hidden, 1), dtype=jnp.float32)
    b2 = 0.1 * jax.random.normal(k_b2, (1, 1), dtype=jnp.float32)

    # 1) f32 path vs f32 reference (tight tolerance).
    out_f32 = jax.block_until_ready(
        treatment_forward(x, w1_t, b1, gamma, beta, w2_t, b2, use_bf16_matmul=False))
    ref = reference_forward(x, w1_t, b1, gamma, beta, w2_t, b2)
    assert out_f32.shape == (batch_size, 1)
    assert jnp.allclose(out_f32, ref, atol=1e-4, rtol=1e-3), "f32 path mismatch vs reference"

    # 2) default bf16-x path vs a bf16-input-consistent f32 reference.
    out_bf16 = jax.block_until_ready(
        treatment_forward(x, w1_t, b1, gamma, beta, w2_t, b2))
    ref_bf16 = reference_forward(x.astype(jnp.bfloat16).astype(jnp.float32),
                                 w1_t.astype(jnp.bfloat16).astype(jnp.float32),
                                 b1, gamma, beta, w2_t, b2)
    assert out_bf16.shape == (batch_size, 1)
    assert jnp.allclose(out_bf16, ref_bf16, atol=2e-3, rtol=2e-3), "bf16 path mismatch"

    # 3) multi-tile + 2-way phase-0 split path (small tiles forced for coverage).
    x_big = jax.random.normal(k_x2, (1024, n_embedding), dtype=jnp.float32)
    out_big = jax.block_until_ready(
        treatment_forward(x_big, w1_t, b1, gamma, beta, w2_t, b2,
                          use_bf16_matmul=False, max_tile_rows=256))
    ref_big = reference_forward(x_big, w1_t, b1, gamma, beta, w2_t, b2)
    assert out_big.shape == (1024, 1)
    assert jnp.allclose(out_big, ref_big, atol=1e-3, rtol=1e-3), "multi-tile mismatch"

    print("KERNEL_OK")
</pallas_src>

<mosaic_0001>
module attributes {stable_mosaic.version = 11 : i64} {
  func.func @_stats_kernel(%arg0: i32, %arg1: i32, %arg2: memref<128x32xf32, #tpu.memory_space<vmem>>, %arg3: memref<32x16xf32, #tpu.memory_space<vmem>>, %arg4: memref<1x16xf32, #tpu.memory_space<vmem>>, %arg5: memref<1x2x16xf32, #tpu.memory_space<vmem>>, %arg6: memref<2x16xf32, #tpu.memory_space<vmem>>) attributes {dimension_semantics = [#tpu.dimension_semantics<parallel>, #tpu.dimension_semantics<arbitrary>], iteration_bounds = array<i64: 1, 1>, scalar_prefetch = 0 : i64, scratch_operands = 1 : i64, tpu.core_type = #tpu.core_type<tc>, window_params = [{transform_indices = @transform_0, window_bounds = array<i64: 128, 32>}, {pipeline_mode = #tpu.pipeline_mode<synchronous>, transform_indices = @transform_1, window_bounds = array<i64: 32, 16>}, {pipeline_mode = #tpu.pipeline_mode<synchronous>, transform_indices = @transform_2, window_bounds = array<i64: 1, 16>}, {transform_indices = @transform_3, window_bounds = array<i64: 1, 2, 16>}]} {
    %c0_i32 = arith.constant 0 : i32
    %0 = arith.cmpi eq, %arg1, %c0_i32 : i32
    %1 = arith.extui %0 : i1 to i32
    %c0_i32_0 = arith.constant 0 : i32
    %2 = arith.cmpi ne, %1, %c0_i32_0 : i32
    scf.if %2 {
      %cst_20 = arith.constant 0.000000e+00 : f32
      %35 = vector.broadcast %cst_20 : f32 to vector<2x16xf32>
      %c0_21 = arith.constant 0 : index
      %c0_22 = arith.constant 0 : index
      %36 = vector.load %arg6[%c0_21, %c0_22] : memref<2x16xf32, #tpu.memory_space<vmem>>, vector<2x16xf32>
      tpu.vector_store %arg6[%c0_21, %c0_22], %35 {strides = array<i32>} : memref<2x16xf32, #tpu.memory_space<vmem>>, vector<2x16xf32>,
    } else {
    }
    %c0 = arith.constant 0 : index
    %c0_1 = arith.constant 0 : index
    %3 = vector.load %arg3[%c0, %c0_1] : memref<32x16xf32, #tpu.memory_space<vmem>>, vector<32x16xf32>
    %c0_2 = arith.constant 0 : index
    %c0_3 = arith.constant 0 : index
    %4 = vector.load %arg4[%c0_2, %c0_3] : memref<1x16xf32, #tpu.memory_space<vmem>>, vector<1x16xf32>
    %cst = arith.constant 0.000000e+00 : f32
    %5 = vector.broadcast %cst : f32 to vector<1x16xf32>
    %6 = arith.maximumf %4, %5 : vector<1x16xf32>
    %cst_4 = arith.constant 0.000000e+00 : f32
    %7 = vector.broadcast %cst_4 : f32 to vector<1x16xf32>
    %c0_i32_5 = arith.constant 0 : i32
    %c128_i32 = arith.constant 128 : i32
    %8 = arith.muli %c0_i32_5, %c128_i32 : i32
    %9 = tpu.assume_multiple %8, 128 : i32
    %10 = arith.index_cast %9 : i32 to index
    %c0_6 = arith.constant 0 : index
    %11 = vector.load %arg2[%10, %c0_6] : memref<128x32xf32, #tpu.memory_space<vmem>>, vector<128x32xf32>
    %cst_7 = arith.constant dense<0.000000e+00> : vector<128x16xf32>
    %12 = tpu.matmul %11, %3, %cst_7 {dimension_numbers = #tpu.dot_dimension_numbers<[1], [0], [0], [1], [0, 0, 1, 1], [], []>} : vector<128x32xf32>, vector<32x16xf32>, vector<128x16xf32> -> vector<128x16xf32>
    %13 = vector.broadcast %4 : vector<1x16xf32> to vector<128x16xf32>
    %14 = arith.addf %12, %13 : vector<128x16xf32>
    %cst_8 = arith.constant 0.000000e+00 : f32
    %15 = vector.broadcast %cst_8 : f32 to vector<128x16xf32>
    %16 = arith.maximumf %14, %15 : vector<128x16xf32>
    %17 = vector.broadcast %6 : vector<1x16xf32> to vector<128x16xf32>
    %18 = arith.subf %16, %17 : vector<128x16xf32>
    %cst_9 = arith.constant dense<0.000000e+00> : vector<16xf32>
    %19 = vector.multi_reduction <add>, %18, %cst_9 [0] : vector<128x16xf32> to vector<16xf32>
    %20 = vector.shape_cast %19 : vector<16xf32> to vector<1x16xf32>
    %21 = arith.addf %7, %20 : vector<1x16xf32>
    %22 = arith.mulf %18, %18 : vector<128x16xf32>
    %cst_10 = arith.constant dense<0.000000e+00> : vector<16xf32>
    %23 = vector.multi_reduction <add>, %22, %cst_10 [0] : vector<128x16xf32> to vector<16xf32>
    %24 = vector.shape_cast %23 : vector<16xf32> to vector<1x16xf32>
    %25 = arith.addf %7, %24 : vector<1x16xf32>
    %c1_i32 = arith.constant 1 : i32
    %c0_11 = arith.constant 0 : index
    %c0_12 = arith.constant 0 : index
    %26 = vector.load %arg6[%c0_11, %c0_12] : memref<2x16xf32, #tpu.memory_space<vmem>>, vector<1x16xf32>
    %27 = arith.addf %26, %21 : vector<1x16xf32>
    %c0_13 = arith.constant 0 : index
    %c0_14 = arith.constant 0 : index
    %28 = vector.load %arg6[%c0_13, %c0_14] : memref<2x16xf32, #tpu.memory_space<vmem>>, vector<1x16xf32>
    tpu.vector_store %arg6[%c0_13, %c0_14], %27 {strides = array<i32>} : memref<2x16xf32, #tpu.memory_space<vmem>>, vector<1x16xf32>,
    %c1 = arith.constant 1 : index
    %c0_15 = arith.constant 0 : index
    %29 = vector.load %arg6[%c1, %c0_15] : memref<2x16xf32, #tpu.memory_space<vmem>>, vector<1x16xf32>
    %30 = arith.addf %29, %25 : vector<1x16xf32>
    %c1_16 = arith.constant 1 : index
    %c0_17 = arith.constant 0 : index
    %31 = vector.load %arg6[%c1_16, %c0_17] : memref<2x16xf32, #tpu.memory_space<vmem>>, vector<1x16xf32>
    tpu.vector_store %arg6[%c1_16, %c0_17], %30 {strides = array<i32>} : memref<2x16xf32, #tpu.memory_space<vmem>>, vector<1x16xf32>,
    %c0_i32_18 = arith.constant 0 : i32
    %32 = arith.cmpi eq, %arg1, %c0_i32_18 : i32
    %33 = arith.extui %32 : i1 to i32
    %c0_i32_19 = arith.constant 0 : i32
    %34 = arith.cmpi ne, %33, %c0_i32_19 : i32
    scf.if %34 {
      %c0_20 = arith.constant 0 : index
      %c0_21 = arith.constant 0 : index
      %35 = vector.load %arg6[%c0_20, %c0_21] : memref<2x16xf32, #tpu.memory_space<vmem>>, vector<2x16xf32>
      %36 = vector.shape_cast %35 : vector<2x16xf32> to vector<1x2x16xf32>
      %c0_22 = arith.constant 0 : index
      %c0_23 = arith.constant 0 : index
      %c0_24 = arith.constant 0 : index
      %37 = vector.load %arg5[%c0_22, %c0_23, %c0_24] : memref<1x2x16xf32, #tpu.memory_space<vmem>>, vector<1x2x16xf32>
      tpu.vector_store %arg5[%c0_22, %c0_23, %c0_24], %36 {strides = array<i32>} : memref<1x2x16xf32, #tpu.memory_space<vmem>>, vector<1x2x16xf32>,
    } else {
    }
    return
  }
  func.func @transform_0(%arg0: i32, %arg1: i32) -> (i32, i32) {
    %c1_i32 = arith.constant 1 : i32
    %0 = arith.muli %arg0, %c1_i32 : i32
    %1 = arith.addi %0, %arg1 : i32
    %c0_i32 = arith.constant 0 : i32
    %c0_i32_0 = arith.constant 0 : i32
    return %1, %c0_i32 : i32, i32
  }
  func.func @transform_1(%arg0: i32, %arg1: i32) -> (i32, i32) {
    %c0_i32 = arith.constant 0 : i32
    %c0_i32_0 = arith.constant 0 : i32
    %c0_i32_1 = arith.constant 0 : i32
    return %c0_i32, %c0_i32_0 : i32, i32
  }
  func.func @transform_2(%arg0: i32, %arg1: i32) -> (i32, i32) {
    %c0_i32 = arith.constant 0 : i32
    %c0_i32_0 = arith.constant 0 : i32
    %c0_i32_1 = arith.constant 0 : i32
    return %c0_i32, %c0_i32_0 : i32, i32
  }
  func.func @transform_3(%arg0: i32, %arg1: i32) -> (i32, i32, i32) {
    %c0_i32 = arith.constant 0 : i32
    %c0_i32_0 = arith.constant 0 : i32
    %c0_i32_1 = arith.constant 0 : i32
    return %arg0, %c0_i32, %c0_i32_0 : i32, i32, i32
  }
}

</mosaic_0001>

<bundles_post_ra>
// kernel: tpu_custom_call.1
= control target key start
LH: loop header
LB: loop body
LE: loop exit
PB: predicated region body
PF: predicated region fallthrough
CT: control target
= control target key end

     0   :  { %vm71_vm0 = vcmask 261120   ;;  %s708_s0 = inlined_call_operand.vmem [shape: f32[128,32], index: 0, kind: input, shape index: {}]   ;;  %s709_s1 = inlined_call_operand.vmem [shape: f32[32,16], index: 1, kind: input, shape index: {}]   ;;  %s710_s2 = inlined_call_operand.vmem [shape: f32[1,16], index: 2, kind: input, shape index: {}]   ;;  %s711_s3 = inlined_call_operand.hbm [shape: f32[1,2,16], index: 3, kind: output, shape index: {}]  }
   0x1   :  { %v46_v0 = vld [vmem:[%s709_s1 + $0x18] sm:$0xff]  ;;  %v45_v1 = vld [vmem:[%s709_s1 + $0x10] sm:$0xff]  ;;  %v49_v2 = vld [vmem:[%s708_s0] sm:$0xff] }
   0x2   :  { %465 = vmatprep.subr.mxu0 %v46_v0  ;;  %497 = vmatprep.subr.mxu1 %v46_v0  ;;  %v44_v3 = vld [vmem:[%s709_s1 + $0x8] sm:$0xff]  ;;  %v43_v4 = vld [vmem:[%s709_s1] sm:$0xff]  ;;  %v51_v6 = vld [vmem:[%s708_s0 + $0x10] sm:$0xff] }
   0x3   :  { %466 = vmatpush3.msra.mxu0 %v46_v0  ;;  %473 = vmatprep.mubr.msk.f32.mxu0 %vm71_vm0, %v49_v2  ;;  %v50_v5 = vld [vmem:[%s708_s0 + $0x8] sm:$0xff]  ;;  %v57_v7 = vld [vmem:[%s708_s0 + $0x40] sm:$0xff] }
   0x4   :  { %467 = vmatprep.subr.mxu0 %v45_v1  ;;  %501 = vmatpush3.msra.mxu1 %v46_v0 }
   0x5   :  { %468 = vmatpush3.msra.mxu0 %v45_v1  ;;  %498 = vmatprep.subr.mxu1 %v45_v1 }
   0x6   :  { %469 = vmatprep.subr.mxu0 %v44_v3  ;;  %502 = vmatpush3.msra.mxu1 %v45_v1 }
   0x7   :  { %470 = vmatpush3.msra.mxu0 %v44_v3  ;;  %499 = vmatprep.subr.mxu1 %v44_v3 }
   0x8   :  { %471 = vmatprep.subr.mxu0 %v43_v4  ;;  %503 = vmatpush3.msra.mxu1 %v44_v3 }
   0x9   :  { %8 = vsyncpa [#allocation4], 0  ;;  %472 = vmatpush3.msra.mxu0 %v43_v4  ;;  %500 = vmatprep.subr.mxu1 %v43_v4  ;;  %v58_v8 = vld [vmem:[%s708_s0 + $0x48] sm:$0xff]  ;;  %v59_v9 = vld [vmem:[%s708_s0 + $0x50] sm:$0xff]  ;;  %vm41_vm1 = vcmask 123904   ;;  %v529_v20 = vmov 0.0   ;;  %v66_v21 = vlaneseq }
   0xa   :  { %474 = vmatmul.mubr.msk.f32.vlgmr.msra.gmra.mxu0 %vm71_vm0, %v50_v5  ;;  %504 = vmatpush3.msra.mxu1 %v43_v4  ;;  %v52_v10 = vld [vmem:[%s708_s0 + $0x18] sm:$0xff]  ;;  %v53_v11 = vld [vmem:[%s708_s0 + $0x20] sm:$0xff]  ;;  %v54_v14 = vld [vmem:[%s708_s0 + $0x28] sm:$0xff]  ;;  %42 = vst.msk [vmem:[#allocation2] sm:$0x3] %vm41_vm1, %v529_v20  ;;  %vm303_vm2 = vcmask 130048  }
   0xb   :  { %476 = vmatprep.mubr.msk.f32.mxu0 %vm71_vm0, %v51_v6  ;;  %485 = vmatprep.mubr.msk.f32.mxu1 %vm71_vm0, %v57_v7  ;;  %v60_v12 = vld [vmem:[%s708_s0 + $0x58] sm:$0xff]  ;;  %v61_v13 = vld [vmem:[%s708_s0 + $0x60] sm:$0xff]  ;;  %v55_v15 = vld [vmem:[%s708_s0 + $0x30] sm:$0xff]  ;;  %v67_v22 = vshrl.u32 %v66_v21, 7  ;;  %vm398_vm3 = vcmask 122880  }
   0xc   :  { %486 = vmatmul.mubr.msk.f32.vlgmr.msra.gmra.mxu1 %vm71_vm0, %v58_v8  ;;  %v62_v16 = vld [vmem:[%s708_s0 + $0x68] sm:$0xff]  ;;  %v63_v17 = vld [vmem:[%s708_s0 + $0x70] sm:$0xff]  ;;  %v56_v18 = vld [vmem:[%s708_s0 + $0x38] sm:$0xff] }
   0xd   :  { %488 = vmatprep.mubr.msk.f32.mxu1 %vm71_vm0, %v59_v9  ;;  %v64_v19 = vld [vmem:[%s708_s0 + $0x78] sm:$0xff]  ;;  %v68_v23 = vsub.s32 0, %v67_v22  ;;  %v47_v24 = vld [vmem:[%s710_s2] sm:$0x1]  ;;  %s530_s0 = smov [#allocation3]  }
   0xe   :  { %477 = vmatmul.mubr.msk.f32.gmra.mxu0 %vm71_vm0, %v52_v10  ;;  %v48_v25 = vmax.f32 %v47_v24, 0.0  ;;  %s415_s2 = sshll.u32 %s530_s0, 4  ;;  %s416_s2 = int_to_ptr.vmem [resolvable:$true] %s415_s2 }
   0xf   :  { %479 = vmatprep.mubr.msk.f32.mxu0 %vm71_vm0, %v53_v11  ;;  %v631_v26 = vrot.slane %v47_v24, %v68_v23  ;;  %s507_s26 = scalar_lea.vmem %s416_s2, 32  ;;  %p512_p1 = scmp.lt.s32.totalorder %s416_s2, %s416_s2 }
  0x10   :  { %489 = vmatmul.mubr.msk.f32.gmra.mxu1 %vm71_vm0, %v60_v12  ;;  %v634_v29 = vrot.slane %v48_v25, %v68_v23  ;;  %p508_p0 = scmp.ne.s32.totalorder %s416_s2, %s507_s26  ;;  %p513_p2 = scmp.lt.s32.totalorder %s507_s26, %s507_s26 }
  0x11   :  { %491 = vmatprep.mubr.msk.f32.mxu1 %vm71_vm0, %v61_v13 }
  0x12   :  { %480 = vmatmul.mubr.msk.f32.gmra.mxu0 %vm71_vm0, %v54_v14  ;;  %p514_p3 = por %p513_p2, %p512_p1 }
  0x13   :  { %482 = vmatprep.mubr.msk.f32.mxu0 %vm71_vm0, %v55_v15 }
  0x14   :  { %492 = vmatmul.mubr.msk.f32.gmra.mxu1 %vm71_vm0, %v62_v16  ;;  %p515_p4 = pnand %p514_p3, %p508_p0 }
  0x15   :  { %494 = vmatprep.mubr.msk.f32.mxu1 %vm71_vm0, %v63_v17 }
  0x16   :  { %483 = vmatmul.mubr.msk.f32.gmra.mxu0 %vm71_vm0, %v56_v18 }
  0x18   :  { %495 = vmatmul.mubr.msk.f32.gmra.mxu1 %vm71_vm0, %v64_v19 }
  0xca   :  { %v475_v27 = vpop.f32.mrf.mxu0 }
  0xcb   :  { %v192_v28 = vadd.f32 %v475_v27, %v631_v26 }
  0xcc   :  { %v186_v30 = vpop.f32.mrf.mxu0  ;;  %v487_v31 = vpop.f32.mrf.mxu1 }
  0xcd   :  { %v266_v32 = vmax.f32 %v192_v28, 0.0  ;;  %v187_v33 = vadd.f32 %v186_v30, %v631_v26  ;;  %v232_v34 = vadd.f32 %v487_v31, %v631_v26 }
  0xce   :  { %v478_v35 = vpop.f32.mrf.mxu0  ;;  %v226_v36 = vpop.f32.mrf.mxu1 }
  0xcf   :  { %v288_v37 = vsub.f32 %v266_v32, %v634_v29  ;;  %v265_v38 = vmax.f32 %v187_v33, 0.0  ;;  %v202_v39 = vadd.f32 %v478_v35, %v631_v26  ;;  %v274_v44 = vmax.f32 %v232_v34, 0.0 }
  0xd0   :  { %v196_v40 = vpop.f32.mrf.mxu0  ;;  %v490_v41 = vpop.f32.mrf.mxu1  ;;  %v227_v48 = vadd.f32 %v226_v36, %v631_v26 }
  0xd1   :  { %v287_v42 = vsub.f32 %v265_v38, %v634_v29  ;;  %v268_v43 = vmax.f32 %v202_v39, 0.0  ;;  %v343_v45 = vmul.f32 %v288_v37, %v288_v37  ;;  %v197_v46 = vadd.f32 %v196_v40, %v631_v26 }
  0xd2   :  { %v481_v47 = vpop.f32.mrf.mxu0  ;;  %v236_v49 = vpop.f32.mrf.mxu1  ;;  %v305_v56 = vsel %vm303_vm2, %v288_v37, 0.0  ;;  %v650_v59 = vsub.f32 %v274_v44, %v634_v29  ;;  %v273_v1 = vmax.f32 %v227_v48, 0.0  ;;  %v242_v19 = vadd.f32 %v490_v41, %v631_v26 }
  0xd3   :  { %v342_v50 = vmul.f32 %v287_v42, %v287_v42  ;;  %v290_v51 = vsub.f32 %v268_v43, %v634_v29  ;;  %v304_v52 = vsel %vm303_vm2, %v287_v42, 0.0  ;;  %v267_v53 = vmax.f32 %v197_v46, 0.0 }
  0xd4   :  { %v212_v54 = vadd.f32 %v481_v47, %v631_v26  ;;  %v206_v55 = vpop.f32.mrf.mxu0  ;;  %v493_v60 = vpop.f32.mrf.mxu1  ;;  %v359_v61 = vsel %vm303_vm2, %v343_v45, 0.0  ;;  %v306_v2 = vadd.f32 %v305_v56, %v304_v52  ;;  %v295_v18 = vsub.f32 %v273_v1, %v634_v29 }
  0xd5   :  { %v358_v57 = vsel %vm303_vm2, %v342_v50, 0.0  ;;  %v207_v58 = vadd.f32 %v206_v55, %v631_v26  ;;  %v289_v62 = vsub.f32 %v267_v53, %v634_v29  ;;  %v345_v3 = vmul.f32 %v290_v51, %v290_v51 }
  0xd6   :  { %v270_v63 = vmax.f32 %v212_v54, 0.0  ;;  %v484_v0 = vpop.f32.mrf.mxu0  ;;  %v360_v6 = vadd.f32 %v359_v61, %v358_v57  ;;  %v246_v15 = vpop.f32.mrf.mxu1  ;;  %v309_v16 = vsel %vm303_vm2, %v290_v51, 0.0  ;;  %v351_v33 = vmul.f32 %v650_v59, %v650_v59 }
  0xd7   :  { %v269_v4 = vmax.f32 %v207_v58, 0.0  ;;  %v222_v5 = vadd.f32 %v484_v0, %v631_v26  ;;  %v307_v7 = vsel %vm303_vm2, %v289_v62, 0.0  ;;  %v344_v8 = vmul.f32 %v289_v62, %v289_v62 }
  0xd8   :  { %v292_v9 = vsub.f32 %v270_v63, %v634_v29  ;;  %v216_v10 = vpop.f32.mrf.mxu0  ;;  %v308_v11 = vadd.f32 %v307_v7, %v306_v2  ;;  %v363_v24 = vsel %vm303_vm2, %v345_v3, 0.0  ;;  %v496_v34 = vpop.f32.mrf.mxu1  ;;  %v319_v37 = vsel %vm303_vm2, %v295_v18, 0.0 }
  0xd9   :  { %v291_v12 = vsub.f32 %v269_v4, %v634_v29  ;;  %v272_v13 = vmax.f32 %v222_v5, 0.0  ;;  %v217_v14 = vadd.f32 %v216_v10, %v631_v26  ;;  %v361_v17 = vsel %vm303_vm2, %v344_v8, 0.0 }
  0xda   :  { %v362_v20 = vadd.f32 %v361_v17, %v360_v6  ;;  %v310_v21 = vadd.f32 %v309_v16, %v308_v11  ;;  %v347_v25 = vmul.f32 %v292_v9, %v292_v9  ;;  %v313_v35 = vsel %vm303_vm2, %v292_v9, 0.0  ;;  %v256_v52 = vpop.f32.mrf.mxu1 }
  0xdb   :  { %v311_v22 = vsel %vm303_vm2, %v291_v12, 0.0  ;;  %v346_v23 = vmul.f32 %v291_v12, %v291_v12  ;;  %v294_v27 = vsub.f32 %v272_v13, %v634_v29  ;;  %v271_v28 = vmax.f32 %v217_v14, 0.0 }
  0xdc   :  { %v312_v30 = vadd.f32 %v311_v22, %v310_v21  ;;  %v364_v31 = vadd.f32 %v363_v24, %v362_v20  ;;  %v276_v38 = vmax.f32 %v242_v19, 0.0  ;;  %v237_v42 = vadd.f32 %v236_v49, %v631_v26 }
  0xdd   :  { %v365_v32 = vsel %vm303_vm2, %v346_v23, 0.0  ;;  %v293_v36 = vsub.f32 %v271_v28, %v634_v29  ;;  %v349_v40 = vmul.f32 %v294_v27, %v294_v27  ;;  %v367_v43 = vsel %vm303_vm2, %v347_v25, 0.0 }
  0xde   :  { %v366_v39 = vadd.f32 %v365_v32, %v364_v31  ;;  %v314_v41 = vadd.f32 %v313_v35, %v312_v30  ;;  %v252_v46 = vadd.f32 %v493_v60, %v631_v26  ;;  %v317_v47 = vsel %vm303_vm2, %v294_v27, 0.0 }
  0xdf   :  { %v315_v44 = vsel %vm303_vm2, %v293_v36, 0.0  ;;  %v348_v45 = vmul.f32 %v293_v36, %v293_v36  ;;  %v350_v51 = vmul.f32 %v295_v18, %v295_v18  ;;  %v298_v54 = vsub.f32 %v276_v38, %v634_v29 }
  0xe0   :  { %v316_v48 = vadd.f32 %v315_v44, %v314_v41  ;;  %v368_v50 = vadd.f32 %v367_v43, %v366_v39  ;;  %v275_v55 = vmax.f32 %v237_v42, 0.0  ;;  %v247_v49 = vadd.f32 %v246_v15, %v631_v26 }
  0xe1   :  { %v369_v53 = vsel %vm303_vm2, %v348_v45, 0.0  ;;  %v371_v56 = vsel %vm303_vm2, %v349_v40, 0.0  ;;  %v278_v61 = vmax.f32 %v252_v46, 0.0  ;;  %v262_v63 = vadd.f32 %v496_v34, %v631_v26 }
  0xe2   :  { %v370_v57 = vadd.f32 %v369_v53, %v368_v50  ;;  %v318_v58 = vadd.f32 %v317_v47, %v316_v48  ;;  %v297_v60 = vsub.f32 %v275_v55, %v634_v29  ;;  %v277_v62 = vmax.f32 %v247_v49, 0.0 }
  0xe3   :  { %v257_v0 = vadd.f32 %v256_v52, %v631_v26  ;;  %v321_v3 = vsel %vm303_vm2, %v650_v59, 0.0  ;;  %v375_v4 = vsel %vm303_vm2, %v351_v33, 0.0  ;;  %v373_v5 = vsel %vm303_vm2, %v350_v51, 0.0 }
  0xe4   :  { %v320_v1 = vadd.f32 %v319_v37, %v318_v58  ;;  %v372_v2 = vadd.f32 %v371_v56, %v370_v57  ;;  %v352_v6 = vmul.f32 %v297_v60, %v297_v60  ;;  %v353_v8 = vmul.f32 %v298_v54, %v298_v54  ;;  %v400_v56 = vld [vmem:[#allocation2 + $0x1] sm:$0x1] }
  0xe5   :  { %v299_v10 = vsub.f32 %v277_v62, %v634_v29  ;;  %v323_v11 = vsel %vm303_vm2, %v297_v60, 0.0  ;;  %v300_v12 = vsub.f32 %v278_v61, %v634_v29  ;;  %v280_v26 = vmax.f32 %v262_v63, 0.0 }
  0xe6   :  { %v374_v7 = vadd.f32 %v373_v5, %v372_v2  ;;  %v322_v9 = vadd.f32 %v321_v3, %v320_v1  ;;  %v279_v13 = vmax.f32 %v257_v0, 0.0  ;;  %v325_v59 = vsel %vm303_vm2, %v298_v54, 0.0  ;;  %v396_v54 = vld [vmem:[#allocation2] sm:$0x1] }
  0xe7   :  { %v377_v16 = vsel %vm303_vm2, %v352_v6, 0.0  ;;  %v354_v17 = vmul.f32 %v299_v10, %v299_v10  ;;  %v379_v21 = vsel %vm303_vm2, %v353_v8, 0.0  ;;  %v355_v22 = vmul.f32 %v300_v12, %v300_v12 }
  0xe8   :  { %v324_v14 = vadd.f32 %v323_v11, %v322_v9  ;;  %v376_v15 = vadd.f32 %v375_v4, %v374_v7  ;;  %v301_v18 = vsub.f32 %v279_v13, %v634_v29  ;;  %v327_v23 = vsel %vm303_vm2, %v299_v10, 0.0 }
  0xe9   :  { %v302_v24 = vsub.f32 %v280_v26, %v634_v29  ;;  %v329_v28 = vsel %vm303_vm2, %v300_v12, 0.0  ;;  %v381_v30 = vsel %vm303_vm2, %v354_v17, 0.0  ;;  %v383_v34 = vsel %vm303_vm2, %v355_v22, 0.0 }
  0xea   :  { %v378_v19 = vadd.f32 %v377_v16, %v376_v15  ;;  %v326_v20 = vadd.f32 %v325_v59, %v324_v14  ;;  %v356_v31 = vmul.f32 %v301_v18, %v301_v18  ;;  %v331_v36 = vsel %vm303_vm2, %v301_v18, 0.0 }
  0xeb   :  { %v357_v35 = vmul.f32 %v302_v24, %v302_v24  ;;  %v333_v39 = vsel %vm303_vm2, %v302_v24, 0.0 }
  0xec   :  { %v328_v25 = vadd.f32 %v327_v23, %v326_v20  ;;  %v380_v27 = vadd.f32 %v379_v21, %v378_v19  ;;  %v385_v29 = vsel %vm303_vm2, %v356_v31, 0.0 }
  0xed   :  { %v387_v42 = vsel %vm303_vm2, %v357_v35, 0.0 }
  0xee   :  { %v382_v32 = vadd.f32 %v381_v30, %v380_v27  ;;  %v330_v33 = vadd.f32 %v329_v28, %v328_v25 }
  0xf0   :  { %v332_v37 = vadd.f32 %v331_v36, %v330_v33  ;;  %v384_v38 = vadd.f32 %v383_v34, %v382_v32 }
  0xf2   :  { %v334_v40 = vadd.f32 %v333_v39, %v332_v37  ;;  %v386_v41 = vadd.f32 %v385_v29, %v384_v38 }
  0xf4   :  { %v335_v43 = vrot.slane %v334_v40, 4  ;;  %v388_v44 = vadd.f32 %v387_v42, %v386_v41 }
  0xf6   :  { %v336_v45 = vadd.f32 %v335_v43, %v334_v40  ;;  %v389_v46 = vrot.slane %v388_v44, 4 }
  0xf8   :  { %v337_v47 = vrot.slane %v336_v45, 2  ;;  %v390_v48 = vadd.f32 %v389_v46, %v388_v44 }
  0xfa   :  { %v338_v50 = vadd.f32 %v337_v47, %v336_v45  ;;  %v391_v51 = vrot.slane %v390_v48, 2 }
  0xfc   :  { %v339_v52 = vrot.slane %v338_v50, 1  ;;  %v392_v53 = vadd.f32 %v391_v51, %v390_v48 }
  0xfe   :  { %v340_v55 = vadd.f32 %v339_v52, %v338_v50  ;;  %v393_v49 = vrot.slane %v392_v53, 1 }
 0x100   :  { %v394_v57 = vadd.f32 %v393_v49, %v392_v53  ;;  %v397_v58 = vadd.f32 %v396_v54, %v340_v55 }
 0x102   :  { %399 = vst.msk [vmem:[#allocation2] sm:$0x1] %vm398_vm3, %v397_v58  ;;  %v401_v61 = vadd.f32 %v400_v56, %v394_v57 }
 0x104   :  { %402 = vst.msk [vmem:[#allocation2 + $0x1] sm:$0x1] %vm398_vm3, %v401_v61 }
 0x10b   :  { %v406_v60 = vld [vmem:[#allocation2] sm:$0x3] }
 0x10c   :  { %408 = vst.msk [vmem:[#allocation3] sm:$0x3] %vm41_vm1, %v406_v60 }
 0x10d   :  { %518 = shalt.err (!%p515_p4)
}
 0x10e   :  { %418 = dma.vmem_to_hbm [thread:$0]  %s416_s2, 32, %s711_s3, [#allocation4]  }
 0x10f   :  { %527 = dma.done.wait [#allocation4], 32  }
 0x110   :  { %528 = vsyncadd [#allocation4], 4294967264 }
 0x111   :  { %422 = vsyncpa [#allocation4], 1 }

</bundles_post_ra>
